<compile_context>
chip_gen: v6e
topology: v6e:2x2x1
jax: 0.10.0
libtpu: 0.0.40
codegen_flags: <defaults>
</compile_context>

<pallas_src>
import functools

import jax
import jax.numpy as jnp
from jax import lax
from jax.experimental import pallas as pl
from jax.experimental.pallas import tpu as pltpu

NEG_LARGE = -1.0e30  # finite "minus infinity": exp(NEG_LARGE - m) == 0 in f32


def _round_up(x, m):
    return (x + m - 1) // m * m


def _contrastive_kernel(fx_ref, fy_ref, o_ref, qn_sc, m_sc, l_sc, d_sc,
                        *, inv_temp, batch, tile, mask_keys, dot_dtype):
    i = pl.program_id(0)          # query block
    k = pl.program_id(1)          # key block (reduction axis, iterated last)
    nk = pl.num_programs(1)

    eps2 = jnp.float32(1e-24)     # (1e-12)^2 -> matches F.normalize eps clamp

    @pl.when(k == 0)
    def _init():
        m_sc[...] = jnp.full_like(m_sc, NEG_LARGE)
        l_sc[...] = jnp.zeros_like(l_sc)
        # Normalize + temperature-scale the query block ONCE and cache it.
        fx = fx_ref[...].astype(jnp.float32)                       # [T, D]
        fx_inv = lax.rsqrt(
            jnp.maximum(jnp.sum(fx * fx, axis=-1, keepdims=True), eps2))
        qn_sc[...] = (fx * (fx_inv * jnp.float32(inv_temp))).astype(qn_sc.dtype)

    # Key-block normalization (this block changes every step, must be redone).
    fy = fy_ref[...].astype(jnp.float32)                           # [T, D]
    fy_inv = lax.rsqrt(
        jnp.maximum(jnp.sum(fy * fy, axis=-1, keepdims=True), eps2))
    fy_n = (fy * fy_inv).astype(dot_dtype)

    # logits_t[kk, qq] = <fy_n[kk], fx_n[qq]>  (keys on sublanes, queries on lanes)
    logits_t = lax.dot_general(
        fy_n, qn_sc[...],
        dimension_numbers=(((1,), (1,)), ((), ())),
        preferred_element_type=jnp.float32)                        # [T, T] f32

    if mask_keys:
        key_idx = k * tile + lax.broadcasted_iota(jnp.int32, logits_t.shape, 0)
        logits_t = jnp.where(key_idx < batch, logits_t, jnp.float32(NEG_LARGE))

    # The positive-pair logit (global diagonal) lives only in the matching block.
    @pl.when(k == i)
    def _diag():
        rows = lax.broadcasted_iota(jnp.int32, logits_t.shape, 0)
        cols = lax.broadcasted_iota(jnp.int32, logits_t.shape, 1)
        d_sc[...] = jnp.sum(jnp.where(rows == cols, logits_t, jnp.float32(0.0)),
                            axis=0, keepdims=True)

    # Online logsumexp over the key (sublane) axis.
    m_prev = m_sc[...]                                             # [1, T]
    m_new = jnp.maximum(m_prev, jnp.max(logits_t, axis=0, keepdims=True))
    alpha = jnp.exp(m_prev - m_new)
    l_sc[...] = alpha * l_sc[...] + jnp.sum(jnp.exp(logits_t - m_new),
                                            axis=0, keepdims=True)
    m_sc[...] = m_new

    @pl.when(k == nk - 1)
    def _finalize():
        # per-row loss = logsumexp(row) - logits[row, row]   (lane-dense write)
        o_ref[...] = m_sc[...] + jnp.log(l_sc[...]) - d_sc[...]


def contrastive_loss(f_x, f_y, temperature=0.07, *, block=256,
                     vmem_limit_bytes=None):
    """Pallas TPU implementation of ContrastiveLoss.forward.

    f_x, f_y: [B, D] float arrays.  Returns a scalar float32 loss.
    `block` is the query/key tile size (rounded to a multiple of 128);
    tune per generation (e.g. 512 on v7x, up to 1024 on v6e if VMEM allows).
    """
    assert f_x.shape == f_y.shape and f_x.ndim == 2
    B, D = f_x.shape

    # Pad to TPU-friendly shapes (lanes of 128); padded keys are masked
    # inside the kernel, padded query rows are dropped before the mean.
    block = max(128, _round_up(block, 128))
    b_pad0 = _round_up(B, 128)
    T = min(block, b_pad0)
    B_pad = _round_up(B, T)
    D_pad = _round_up(D, 128)

    if (B_pad, D_pad) != (B, D):
        f_x = jnp.pad(f_x, ((0, B_pad - B), (0, D_pad - D)))
        f_y = jnp.pad(f_y, ((0, B_pad - B), (0, D_pad - D)))

    n_blocks = B_pad // T
    dot_dtype = jnp.bfloat16 if f_x.dtype == jnp.bfloat16 else jnp.float32

    kernel = functools.partial(
        _contrastive_kernel,
        inv_temp=1.0 / float(temperature),
        batch=B,
        tile=T,
        mask_keys=(B_pad != B),
        dot_dtype=dot_dtype,
    )

    cp_kwargs = dict(dimension_semantics=("parallel", "arbitrary"))
    if vmem_limit_bytes is not None:
        cp_kwargs["vmem_limit_bytes"] = vmem_limit_bytes

    per_row = pl.pallas_call(
        kernel,
        out_shape=jax.ShapeDtypeStruct((n_blocks, T), jnp.float32),
        grid_spec=pltpu.PrefetchScalarGridSpec(
            num_scalar_prefetch=0,
            grid=(n_blocks, n_blocks),
            in_specs=[
                pl.BlockSpec((T, D_pad), lambda i, k: (i, 0)),   # f_x (queries)
                pl.BlockSpec((T, D_pad), lambda i, k: (k, 0)),   # f_y (keys)
            ],
            out_specs=pl.BlockSpec((1, T), lambda i, k: (i, 0)),
            scratch_shapes=[
                pltpu.VMEM((T, D_pad), dot_dtype),  # cached normalized queries
                pltpu.VMEM((1, T), jnp.float32),    # running max  m
                pltpu.VMEM((1, T), jnp.float32),    # running sum  l
                pltpu.VMEM((1, T), jnp.float32),    # diagonal logit
            ],
        ),
        compiler_params=pltpu.CompilerParams(**cp_kwargs),
    )(f_x, f_y)

    return jnp.mean(per_row.reshape(-1)[:B])


def _reference_loss(f_x, f_y, temperature=0.07):
    # Pure-JAX reference mirroring the PyTorch module.
    fx = f_x / jnp.maximum(jnp.linalg.norm(f_x, axis=-1, keepdims=True), 1e-12)
    fy = f_y / jnp.maximum(jnp.linalg.norm(f_y, axis=-1, keepdims=True), 1e-12)
    logits = (fx @ fy.T) / temperature
    n = f_x.shape[0]
    logp = jax.nn.log_softmax(logits, axis=-1)
    return -jnp.mean(logp[jnp.arange(n), jnp.arange(n)])


if __name__ == "__main__":
    key = jax.random.PRNGKey(0)
    k1, k2, k3, k4 = jax.random.split(key, 4)

    # Small demo shape implied by the module: [batch, hidden] features.
    B, D = 8, 32
    f_x = jax.random.normal(k1, (B, D), dtype=jnp.float32)
    f_y = jax.random.normal(k2, (B, D), dtype=jnp.float32)

    loss = contrastive_loss(f_x, f_y, temperature=0.07)
    jax.block_until_ready(loss)
    ref = _reference_loss(f_x, f_y, temperature=0.07)
    assert jnp.allclose(loss, ref, atol=1e-4, rtol=1e-4), (loss, ref)

    # Second check exercising the multi-block online-softmax path
    # (grid > 1 along both axes, padded key masking on the last block,
    # cached-query scratch reused across key steps).
    B2, D2 = 200, 96
    g_x = jax.random.normal(k3, (B2, D2), dtype=jnp.float32)
    g_y = jax.random.normal(k4, (B2, D2), dtype=jnp.float32)
    loss2 = contrastive_loss(g_x, g_y, temperature=0.07, block=128)
    jax.block_until_ready(loss2)
    ref2 = _reference_loss(g_x, g_y, temperature=0.07)
    assert jnp.allclose(loss2, ref2, atol=1e-4, rtol=1e-4), (loss2, ref2)

    print("KERNEL_OK")
</pallas_src>

<mosaic_0001>
module attributes {stable_mosaic.version = 11 : i64} {
  func.func @_contrastive_kernel(%arg0: i32, %arg1: i32, %arg2: memref<128x128xf32, #tpu.memory_space<vmem>>, %arg3: memref<128x128xf32, #tpu.memory_space<vmem>>, %arg4: memref<1x128xf32, #tpu.memory_space<vmem>>, %arg5: memref<128x128xf32, #tpu.memory_space<vmem>>, %arg6: memref<1x128xf32, #tpu.memory_space<vmem>>, %arg7: memref<1x128xf32, #tpu.memory_space<vmem>>, %arg8: memref<1x128xf32, #tpu.memory_space<vmem>>) attributes {dimension_semantics = [#tpu.dimension_semantics<parallel>, #tpu.dimension_semantics<arbitrary>], iteration_bounds = array<i64: 1, 1>, scalar_prefetch = 0 : i64, scratch_operands = 4 : i64, tpu.core_type = #tpu.core_type<tc>, window_params = [{transform_indices = @transform_0, window_bounds = array<i64: 128, 128>}, {transform_indices = @transform_1, window_bounds = array<i64: 128, 128>}, {transform_indices = @transform_2, window_bounds = array<i64: 1, 128>}]} {
    %c0_i32 = arith.constant 0 : i32
    %0 = arith.cmpi eq, %arg1, %c0_i32 : i32
    %1 = arith.extui %0 : i1 to i32
    %cst = arith.constant 1.000000e-24 : f32
    %c0_i32_0 = arith.constant 0 : i32
    %2 = arith.cmpi ne, %1, %c0_i32_0 : i32
    scf.if %2 {
      %cst_21 = arith.constant -1.000000e+30 : f32
      %44 = vector.broadcast %cst_21 : f32 to vector<1x128xf32>
      %c0_22 = arith.constant 0 : index
      %c0_23 = arith.constant 0 : index
      %45 = vector.load %arg6[%c0_22, %c0_23] : memref<1x128xf32, #tpu.memory_space<vmem>>, vector<1x128xf32>
      tpu.vector_store %arg6[%c0_22, %c0_23], %44 {strides = array<i32>} : memref<1x128xf32, #tpu.memory_space<vmem>>, vector<1x128xf32>,
      %cst_24 = arith.constant 0.000000e+00 : f32
      %46 = vector.broadcast %cst_24 : f32 to vector<1x128xf32>
      %c0_25 = arith.constant 0 : index
      %c0_26 = arith.constant 0 : index
      %47 = vector.load %arg7[%c0_25, %c0_26] : memref<1x128xf32, #tpu.memory_space<vmem>>, vector<1x128xf32>
      tpu.vector_store %arg7[%c0_25, %c0_26], %46 {strides = array<i32>} : memref<1x128xf32, #tpu.memory_space<vmem>>, vector<1x128xf32>,
      %c0_27 = arith.constant 0 : index
      %c0_28 = arith.constant 0 : index
      %48 = vector.load %arg2[%c0_27, %c0_28] : memref<128x128xf32, #tpu.memory_space<vmem>>, vector<128x128xf32>
      %49 = arith.mulf %48, %48 : vector<128x128xf32>
      %cst_29 = arith.constant dense<0.000000e+00> : vector<128xf32>
      %50 = vector.multi_reduction <add>, %49, %cst_29 [1] : vector<128x128xf32> to vector<128xf32>
      %51 = vector.shape_cast %50 : vector<128xf32> to vector<128x1xf32>
      %52 = vector.broadcast %cst : f32 to vector<128x1xf32>
      %53 = arith.maximumf %51, %52 : vector<128x1xf32>
      %54 = math.rsqrt %53 : vector<128x1xf32>
      %cst_30 = arith.constant 14.2857141 : f32
      %55 = vector.broadcast %cst_30 : f32 to vector<128x1xf32>
      %56 = arith.mulf %54, %55 : vector<128x1xf32>
      %57 = vector.broadcast %56 : vector<128x1xf32> to vector<128x128xf32>
      %58 = arith.mulf %48, %57 : vector<128x128xf32>
      %c0_31 = arith.constant 0 : index
      %c0_32 = arith.constant 0 : index
      %59 = vector.load %arg5[%c0_31, %c0_32] : memref<128x128xf32, #tpu.memory_space<vmem>>, vector<128x128xf32>
      tpu.vector_store %arg5[%c0_31, %c0_32], %58 {strides = array<i32>} : memref<128x128xf32, #tpu.memory_space<vmem>>, vector<128x128xf32>,
    } else {
    }
    %c0 = arith.constant 0 : index
    %c0_1 = arith.constant 0 : index
    %3 = vector.load %arg3[%c0, %c0_1] : memref<128x128xf32, #tpu.memory_space<vmem>>, vector<128x128xf32>
    %4 = arith.mulf %3, %3 : vector<128x128xf32>
    %cst_2 = arith.constant dense<0.000000e+00> : vector<128xf32>
    %5 = vector.multi_reduction <add>, %4, %cst_2 [1] : vector<128x128xf32> to vector<128xf32>
    %6 = vector.shape_cast %5 : vector<128xf32> to vector<128x1xf32>
    %cst_3 = arith.constant 1.000000e-24 : f32
    %7 = vector.broadcast %cst_3 : f32 to vector<128x1xf32>
    %8 = arith.maximumf %6, %7 : vector<128x1xf32>
    %9 = math.rsqrt %8 : vector<128x1xf32>
    %10 = vector.broadcast %9 : vector<128x1xf32> to vector<128x128xf32>
    %11 = arith.mulf %3, %10 : vector<128x128xf32>
    %c0_4 = arith.constant 0 : index
    %c0_5 = arith.constant 0 : index
    %12 = vector.load %arg5[%c0_4, %c0_5] : memref<128x128xf32, #tpu.memory_space<vmem>>, vector<128x128xf32>
    %cst_6 = arith.constant dense<0.000000e+00> : vector<128x128xf32>
    %13 = tpu.matmul %11, %12, %cst_6 {dimension_numbers = #tpu.dot_dimension_numbers<[1], [1], [0], [0], [0, 0, 1, 0], [], []>} : vector<128x128xf32>, vector<128x128xf32>, vector<128x128xf32> -> vector<128x128xf32>
    %c128_i32 = arith.constant 128 : i32
    %14 = arith.muli %arg1, %c128_i32 : i32
    %15 = tpu.iota {dimensions = array<i32: 0>} : vector<128x128xi32>
    %16 = vector.broadcast %14 : i32 to vector<128x128xi32>
    %17 = arith.addi %16, %15 : vector<128x128xi32>
    %c8_i32 = arith.constant 8 : i32
    %18 = vector.broadcast %c8_i32 : i32 to vector<128x128xi32>
    %19 = arith.cmpi slt, %17, %18 : vector<128x128xi32>
    %cst_7 = arith.constant -1.000000e+30 : f32
    %20 = vector.broadcast %cst_7 : f32 to vector<128x128xf32>
    %21 = arith.select %19, %13, %20 : vector<128x128xi1>, vector<128x128xf32>
    %22 = arith.cmpi eq, %arg1, %arg0 : i32
    %23 = arith.extui %22 : i1 to i32
    %c0_i32_8 = arith.constant 0 : i32
    %24 = arith.cmpi ne, %23, %c0_i32_8 : i32
    scf.if %24 {
      %44 = tpu.iota {dimensions = array<i32: 0>} : vector<128x128xi32>
      %45 = tpu.iota {dimensions = array<i32: 1>} : vector<128x128xi32>
      %46 = arith.cmpi eq, %44, %45 : vector<128x128xi32>
      %cst_21 = arith.constant 0.000000e+00 : f32
      %47 = vector.broadcast %cst_21 : f32 to vector<128x128xf32>
      %48 = arith.select %46, %21, %47 : vector<128x128xi1>, vector<128x128xf32>
      %cst_22 = arith.constant dense<0.000000e+00> : vector<128xf32>
      %49 = vector.multi_reduction <add>, %48, %cst_22 [0] : vector<128x128xf32> to vector<128xf32>
      %50 = vector.shape_cast %49 : vector<128xf32> to vector<1x128xf32>
      %c0_23 = arith.constant 0 : index
      %c0_24 = arith.constant 0 : index
      %51 = vector.load %arg8[%c0_23, %c0_24] : memref<1x128xf32, #tpu.memory_space<vmem>>, vector<1x128xf32>
      tpu.vector_store %arg8[%c0_23, %c0_24], %50 {strides = array<i32>} : memref<1x128xf32, #tpu.memory_space<vmem>>, vector<1x128xf32>,
    } else {
    }
    %c0_9 = arith.constant 0 : index
    %c0_10 = arith.constant 0 : index
    %25 = vector.load %arg6[%c0_9, %c0_10] : memref<1x128xf32, #tpu.memory_space<vmem>>, vector<1x128xf32>
    %cst_11 = arith.constant dense<0xFF800000> : vector<128xf32>
    %26 = vector.multi_reduction <maximumf>, %21, %cst_11 [0] : vector<128x128xf32> to vector<128xf32>
    %27 = vector.shape_cast %26 : vector<128xf32> to vector<1x128xf32>
    %28 = arith.maximumf %25, %27 : vector<1x128xf32>
    %29 = arith.subf %25, %28 : vector<1x128xf32>
    %30 = math.exp %29 : vector<1x128xf32>
    %c0_12 = arith.constant 0 : index
    %c0_13 = arith.constant 0 : index
    %31 = vector.load %arg7[%c0_12, %c0_13] : memref<1x128xf32, #tpu.memory_space<vmem>>, vector<1x128xf32>
    %32 = arith.mulf %30, %31 : vector<1x128xf32>
    %33 = vector.broadcast %28 : vector<1x128xf32> to vector<128x128xf32>
    %34 = arith.subf %21, %33 : vector<128x128xf32>
    %35 = math.exp %34 : vector<128x128xf32>
    %cst_14 = arith.constant dense<0.000000e+00> : vector<128xf32>
    %36 = vector.multi_reduction <add>, %35, %cst_14 [0] : vector<128x128xf32> to vector<128xf32>
    %37 = vector.shape_cast %36 : vector<128xf32> to vector<1x128xf32>
    %38 = arith.addf %32, %37 : vector<1x128xf32>
    %c0_15 = arith.constant 0 : index
    %c0_16 = arith.constant 0 : index
    %39 = vector.load %arg7[%c0_15, %c0_16] : memref<1x128xf32, #tpu.memory_space<vmem>>, vector<1x128xf32>
    tpu.vector_store %arg7[%c0_15, %c0_16], %38 {strides = array<i32>} : memref<1x128xf32, #tpu.memory_space<vmem>>, vector<1x128xf32>,
    %c0_17 = arith.constant 0 : index
    %c0_18 = arith.constant 0 : index
    %40 = vector.load %arg6[%c0_17, %c0_18] : memref<1x128xf32, #tpu.memory_space<vmem>>, vector<1x128xf32>
    tpu.vector_store %arg6[%c0_17, %c0_18], %28 {strides = array<i32>} : memref<1x128xf32, #tpu.memory_space<vmem>>, vector<1x128xf32>,
    %c0_i32_19 = arith.constant 0 : i32
    %41 = arith.cmpi eq, %arg1, %c0_i32_19 : i32
    %42 = arith.extui %41 : i1 to i32
    %c0_i32_20 = arith.constant 0 : i32
    %43 = arith.cmpi ne, %42, %c0_i32_20 : i32
    scf.if %43 {
      %c0_21 = arith.constant 0 : index
      %c0_22 = arith.constant 0 : index
      %44 = vector.load %arg6[%c0_21, %c0_22] : memref<1x128xf32, #tpu.memory_space<vmem>>, vector<1x128xf32>
      %c0_23 = arith.constant 0 : index
      %c0_24 = arith.constant 0 : index
      %45 = vector.load %arg7[%c0_23, %c0_24] : memref<1x128xf32, #tpu.memory_space<vmem>>, vector<1x128xf32>
      %46 = math.log %45 : vector<1x128xf32>
      %47 = arith.addf %44, %46 : vector<1x128xf32>
      %c0_25 = arith.constant 0 : index
      %c0_26 = arith.constant 0 : index
      %48 = vector.load %arg8[%c0_25, %c0_26] : memref<1x128xf32, #tpu.memory_space<vmem>>, vector<1x128xf32>
      %49 = arith.subf %47, %48 : vector<1x128xf32>
      %c0_27 = arith.constant 0 : index
      %c0_28 = arith.constant 0 : index
      %50 = vector.load %arg4[%c0_27, %c0_28] : memref<1x128xf32, #tpu.memory_space<vmem>>, vector<1x128xf32>
      tpu.vector_store %arg4[%c0_27, %c0_28], %49 {strides = array<i32>} : memref<1x128xf32, #tpu.memory_space<vmem>>, vector<1x128xf32>,
    } else {
    }
    return
  }
  func.func @transform_0(%arg0: i32, %arg1: i32) -> (i32, i32) {
    %c0_i32 = arith.constant 0 : i32
    %c0_i32_0 = arith.constant 0 : i32
    return %arg0, %c0_i32 : i32, i32
  }
  func.func @transform_1(%arg0: i32, %arg1: i32) -> (i32, i32) {
    %c0_i32 = arith.constant 0 : i32
    %c0_i32_0 = arith.constant 0 : i32
    return %arg1, %c0_i32 : i32, i32
  }
  func.func @transform_2(%arg0: i32, %arg1: i32) -> (i32, i32) {
    %c0_i32 = arith.constant 0 : i32
    %c0_i32_0 = arith.constant 0 : i32
    return %arg0, %c0_i32 : i32, i32
  }
}

</mosaic_0001>

<bundles_post_ra>
// kernel: tpu_custom_call.1
= control target key start
LH: loop header
LB: loop body
LE: loop exit
PB: predicated region body
PF: predicated region fallthrough
CT: control target
= control target key end

     0   :  { %7 = vsyncpa [#allocation7], 0  ;;  %s1264_s0 = inlined_call_operand.hbm [shape: f32[128,128], index: 0, kind: input, shape index: {}]   ;;  %s1265_s1 = inlined_call_operand.hbm [shape: f32[128,128], index: 1, kind: input, shape index: {}]   ;;  %s1266_s2 = inlined_call_operand.hbm [shape: f32[1,128], index: 2, kind: output, shape index: {}]  }
   0x1   :  { %8 = vsyncpa [#allocation10], 0 }
   0x2   :  { %9 = vsyncpa [#allocation8], 0  ;;  %s988_s9 = smov [#allocation6]  }
   0x3   :  { %s15_s10 = sshll.u32 %s988_s9, 4  ;;  %s16_s10 = int_to_ptr.vmem [resolvable:$true] %s15_s10 }
   0x4   :  { %s930_s11 = scalar_lea.vmem %s16_s10, 2048  ;;  %p935_p1 = scmp.lt.s32.totalorder %s16_s10, %s16_s10 }
   0x5   :  { %p931_p0 = scmp.ne.s32.totalorder %s16_s10, %s930_s11  ;;  %p936_p2 = scmp.lt.s32.totalorder %s930_s11, %s930_s11 }
   0x7   :  { %p937_p3 = por %p936_p2, %p935_p1 }
   0x9   :  { %p938_p4 = pnand %p937_p3, %p931_p0 }
   0xb   :  { %941 = shalt.err (!%p938_p4)
}
   0xc   :  { %s989_s12 = smov 128   ;;  %s990_s13 = smov 8  }
   0xd   :  { %21 = dma.hbm_to_vmem [thread:$0]  %s1264_s0, 2048, %s16_s10, [#allocation7], %s989_s12, %s989_s12, %s990_s13  }
   0xe   :  { %s991_s16 = smov [#allocation9]  }
   0xf   :  { %s27_s17 = sshll.u32 %s991_s16, 4  ;;  %s28_s17 = int_to_ptr.vmem [resolvable:$true] %s27_s17 }
  0x10   :  { %s950_s18 = scalar_lea.vmem %s28_s17, 2048  ;;  %p955_p6 = scmp.lt.s32.totalorder %s28_s17, %s28_s17 }
  0x11   :  { %p951_p5 = scmp.ne.s32.totalorder %s28_s17, %s950_s18  ;;  %p956_p7 = scmp.lt.s32.totalorder %s950_s18, %s950_s18 }
  0x13   :  { %p957_p8 = por %p956_p7, %p955_p6 }
  0x15   :  { %p958_p9 = pnand %p957_p8, %p951_p5 }
  0x17   :  { %961 = shalt.err (!%p958_p9)
}
  0x18   :  { %33 = dma.hbm_to_vmem [thread:$0]  %s1265_s1, 2048, %s28_s17, [#allocation10], %s989_s12, %s989_s12, %s990_s13  }
  0x19   :  { %982 = dma.done.wait [#allocation7], 2048  }
  0x1a   :  { %983 = vsyncadd [#allocation7], 4294965248 }
  0x1b   :  { %984 = dma.done.wait [#allocation10], 2048  }
  0x1c   :  { %985 = vsyncadd [#allocation10], 4294965248  ;;  %v1016_v0 = vld [vmem:[#allocation6 + $0x78] sm:$0xff]  ;;  %v1018_v1 = vld [vmem:[#allocation6 + $0x70] sm:$0xff]  ;;  %s994_s0 = smov [#allocation11]  }
  0x1d   :  { %v1020_v2 = vld [vmem:[#allocation6 + $0x68] sm:$0xff]  ;;  %v77_v3 = vmul.f32 %v1016_v0, %v1016_v0  ;;  %v1026_v5 = vld [vmem:[#allocation6 + $0x60] sm:$0xff]  ;;  %v76_v6 = vmul.f32 %v1018_v1, %v1018_v1  ;;  %v1032_v8 = vld [vmem:[#allocation6 + $0x58] sm:$0xff]  ;;  %s713_s1 = sshll.u32 %s994_s0, 4  ;;  %s714_s1 = int_to_ptr.vmem [resolvable:$true] %s713_s1 }
  0x1e   :  { %v75_v4 = vmul.f32 %v1020_v2, %v1020_v2  ;;  %v74_v7 = vmul.f32 %v1026_v5, %v1026_v5  ;;  %v1034_v9 = vld [vmem:[#allocation6 + $0x50] sm:$0xff]  ;;  %v73_v10 = vmul.f32 %v1032_v8, %v1032_v8  ;;  %v1040_v12 = vld [vmem:[#allocation6 + $0x48] sm:$0xff]  ;;  %v1042_v13 = vld [vmem:[#allocation6 + $0x40] sm:$0xff]  ;;  %s962_s21 = scalar_lea.vmem %s714_s1, 16  ;;  %s966_s22 = scalar_lea.vmem %s714_s1, 32 }
  0x1f   :  { %108 = vadd.xlane.f32.xlu0 %v77_v3  ;;  %v72_v11 = vmul.f32 %v1034_v9, %v1034_v9  ;;  %v71_v14 = vmul.f32 %v1040_v12, %v1040_v12  ;;  %v70_v15 = vmul.f32 %v1042_v13, %v1042_v13  ;;  %v1048_v16 = vld [vmem:[#allocation6 + $0x38] sm:$0xff]  ;;  %v1050_v17 = vld [vmem:[#allocation6 + $0x30] sm:$0xff]  ;;  %v1056_v20 = vld [vmem:[#allocation6 + $0x28] sm:$0xff]  ;;  %p963_p10 = scmp.ne.s32.totalorder %s714_s1, %s962_s21  ;;  %p967_p11 = scmp.lt.s32.totalorder %s714_s1, %s714_s1 }
  0x20   :  { %104 = vadd.xlane.f32.xlu1 %v75_v4  ;;  %v69_v18 = vmul.f32 %v1048_v16, %v1048_v16  ;;  %v68_v19 = vmul.f32 %v1050_v17, %v1050_v17  ;;  %v1058_v21 = vld [vmem:[#allocation6 + $0x20] sm:$0xff]  ;;  %v67_v22 = vmul.f32 %v1056_v20, %v1056_v20  ;;  %v1064_v24 = vld [vmem:[#allocation6 + $0x18] sm:$0xff]  ;;  %v1066_v25 = vld [vmem:[#allocation6 + $0x10] sm:$0xff]  ;;  %p968_p12 = scmp.lt.s32.totalorder %s966_s22, %s962_s21 }
  0x21   :  { %v66_v23 = vmul.f32 %v1058_v21, %v1058_v21  ;;  %v65_v26 = vmul.f32 %v1064_v24, %v1064_v24  ;;  %v64_v27 = vmul.f32 %v1066_v25, %v1066_v25  ;;  %v1072_v28 = vld [vmem:[#allocation6 + $0x8] sm:$0xff]  ;;  %v1074_v29 = vld [vmem:[#allocation6] sm:$0xff]  ;;  %v1096_v40 = vld [vmem:[#allocation9 + $0x10] sm:$0xff] }
  0x22   :  { %v63_v30 = vmul.f32 %v1072_v28, %v1072_v28  ;;  %v62_v31 = vmul.f32 %v1074_v29, %v1074_v29  ;;  %v1080_v32 = vld [vmem:[#allocation9] sm:$0xff]  ;;  %v1082_v33 = vld [vmem:[#allocation9 + $0x8] sm:$0xff]  ;;  %v1098_v41 = vld [vmem:[#allocation9 + $0x50] sm:$0xff]  ;;  %v208_v42 = vmul.f32 %v1096_v40, %v1096_v40  ;;  %p969_p13 = por %p968_p12, %p967_p11 }
  0x23   :  { %106 = vadd.xlane.f32.xlu0 %v76_v6  ;;  %v206_v34 = vmul.f32 %v1080_v32, %v1080_v32  ;;  %v207_v35 = vmul.f32 %v1082_v33, %v1082_v33  ;;  %v1088_v36 = vld [vmem:[#allocation9 + $0x40] sm:$0xff]  ;;  %v1090_v37 = vld [vmem:[#allocation9 + $0x48] sm:$0xff]  ;;  %v216_v43 = vmul.f32 %v1098_v41, %v1098_v41  ;;  %v1104_v44 = vld [vmem:[#allocation9 + $0x18] sm:$0xff] }
  0x24   :  { %102 = vadd.xlane.f32.xlu1 %v74_v7  ;;  %v214_v38 = vmul.f32 %v1088_v36, %v1088_v36  ;;  %v215_v39 = vmul.f32 %v1090_v37, %v1090_v37  ;;  %v1106_v45 = vld [vmem:[#allocation9 + $0x58] sm:$0xff]  ;;  %v209_v46 = vmul.f32 %v1104_v44, %v1104_v44  ;;  %v1112_v48 = vld [vmem:[#allocation9 + $0x20] sm:$0xff]  ;;  %v1120_v52 = vld [vmem:[#allocation9 + $0x28] sm:$0xff]  ;;  %p970_p0 = pnand %p969_p13, %p963_p10 }
  0x25   :  { %v217_v47 = vmul.f32 %v1106_v45, %v1106_v45  ;;  %v1114_v49 = vld [vmem:[#allocation9 + $0x60] sm:$0xff]  ;;  %v210_v50 = vmul.f32 %v1112_v48, %v1112_v48  ;;  %v1122_v53 = vld [vmem:[#allocation9 + $0x68] sm:$0xff]  ;;  %v211_v54 = vmul.f32 %v1120_v52, %v1120_v52  ;;  %v1128_v56 = vld [vmem:[#allocation9 + $0x30] sm:$0xff] }
  0x26   :  { %v218_v51 = vmul.f32 %v1114_v49, %v1114_v49  ;;  %v219_v55 = vmul.f32 %v1122_v53, %v1122_v53  ;;  %v1130_v57 = vld [vmem:[#allocation9 + $0x70] sm:$0xff]  ;;  %v212_v58 = vmul.f32 %v1128_v56, %v1128_v56  ;;  %v1136_v60 = vld [vmem:[#allocation9 + $0x38] sm:$0xff] }
  0x27   :  { %100 = vadd.xlane.f32.xlu0 %v73_v10  ;;  %v220_v59 = vmul.f32 %v1130_v57, %v1130_v57  ;;  %v1138_v61 = vld [vmem:[#allocation9 + $0x78] sm:$0xff]  ;;  %v213_v62 = vmul.f32 %v1136_v60, %v1136_v60 }
  0x28   :  { %98 = vadd.xlane.f32.xlu1 %v72_v11  ;;  %v221_v63 = vmul.f32 %v1138_v61, %v1138_v61 }
  0x2b   :  { %96 = vadd.xlane.f32.xlu0 %v71_v14 }
  0x2c   :  { %94 = vadd.xlane.f32.xlu1 %v70_v15 }
  0x2f   :  { %92 = vadd.xlane.f32.xlu0 %v69_v18 }
  0x30   :  { %90 = vadd.xlane.f32.xlu1 %v68_v19 }
  0x33   :  { %88 = vadd.xlane.f32.xlu0 %v67_v22 }
  0x34   :  { %86 = vadd.xlane.f32.xlu1 %v66_v23 }
  0x37   :  { %84 = vadd.xlane.f32.xlu0 %v65_v26 }
  0x38   :  { %82 = vadd.xlane.f32.xlu1 %v64_v27 }
  0x3b   :  { %80 = vadd.xlane.f32.xlu0 %v63_v30 }
  0x3c   :  { %78 = vadd.xlane.f32.xlu1 %v62_v31 }
  0x3f   :  { %222 = vadd.xlane.f32.xlu0 %v206_v34 }
  0x40   :  { %224 = vadd.xlane.f32.xlu1 %v207_v35 }
  0x43   :  { %238 = vadd.xlane.f32.xlu0 %v214_v38 }
  0x44   :  { %240 = vadd.xlane.f32.xlu1 %v215_v39 }
  0x47   :  { %226 = vadd.xlane.f32.xlu0 %v208_v42 }
  0x48   :  { %242 = vadd.xlane.f32.xlu1 %v216_v43 }
  0x4b   :  { %228 = vadd.xlane.f32.xlu0 %v209_v46 }
  0x4c   :  { %244 = vadd.xlane.f32.xlu1 %v217_v47 }
  0x4f   :  { %230 = vadd.xlane.f32.xlu0 %v210_v50 }
  0x50   :  { %246 = vadd.xlane.f32.xlu1 %v218_v51 }
  0x53   :  { %232 = vadd.xlane.f32.xlu0 %v211_v54 }
  0x54   :  { %248 = vadd.xlane.f32.xlu1 %v219_v55 }
  0x57   :  { %234 = vadd.xlane.f32.xlu0 %v212_v58 }
  0x58   :  { %250 = vadd.xlane.f32.xlu1 %v220_v59 }
  0x5b   :  { %236 = vadd.xlane.f32.xlu0 %v213_v62 }
  0x5c   :  { %252 = vadd.xlane.f32.xlu1 %v221_v63 }
  0xa8   :  { %v109_v3 = vpop.xlane.xlu0 %108 }
  0xa9   :  { %v105_v4 = vpop.xlane.xlu1 %104  ;;  %v125_v6 = vmax.f32 %v109_v3, 1e-24 }
  0xaa   :  { %v123_v7 = vmax.f32 %v105_v4, 1e-24 }
  0xab   :  { %850 = vrsqrt.f32 %v125_v6 }
  0xac   :  { %v107_v10 = vpop.xlane.xlu0 %106  ;;  %852 = vrsqrt.f32 %v123_v7 }
  0xad   :  { %v103_v11 = vpop.xlane.xlu1 %102  ;;  %v124_v14 = vmax.f32 %v107_v10, 1e-24 }
  0xae   :  { %v122_v15 = vmax.f32 %v103_v11, 1e-24 }
  0xaf   :  { %854 = vrsqrt.f32 %v124_v14 }
  0xb0   :  { %856 = vrsqrt.f32 %v122_v15  ;;  %v101_v18 = vpop.xlane.xlu0 %100 }
  0xb1   :  { %v99_v19 = vpop.xlane.xlu1 %98  ;;  %v121_v22 = vmax.f32 %v101_v18, 1e-24 }
  0xb2   :  { %v120_v23 = vmax.f32 %v99_v19, 1e-24 }
  0xb3   :  { %858 = vrsqrt.f32 %v121_v22 }
  0xb4   :  { %v97_v26 = vpop.xlane.xlu0 %96  ;;  %860 = vrsqrt.f32 %v120_v23 }
  0xb5   :  { %v95_v27 = vpop.xlane.xlu1 %94  ;;  %v119_v30 = vmax.f32 %v97_v26, 1e-24 }
  0xb6   :  { %v118_v42 = vmax.f32 %v95_v27, 1e-24 }
  0xb7   :  { %862 = vrsqrt.f32 %v119_v30 }
  0xb8   :  { %v851_v31 = vpop.eup %850  ;;  %v93_v34 = vpop.xlane.xlu0 %92  ;;  %864 = vrsqrt.f32 %v118_v42 }
  0xb9   :  { %v91_v35 = vpop.xlane.xlu1 %90  ;;  %v853_v38 = vpop.eup %852  ;;  %v157_v39 = vmul.f32 14.285714, %v851_v31  ;;  %v117_v63 = vmax.f32 %v93_v34, 1e-24 }
  0xba   :  { %v155_v46 = vmul.f32 14.285714, %v853_v38  ;;  %v116_v10 = vmax.f32 %v91_v35, 1e-24 }
  0xbb   :  { %v173_v43 = vmul.f32 %v157_v39, %v1016_v0  ;;  %866 = vrsqrt.f32 %v117_v63 }
  0xbc   :  { %v855_v47 = vpop.eup %854  ;;  %v89_v50 = vpop.xlane.xlu0 %88  ;;  %v171_v59 = vmul.f32 %v155_v46, %v1020_v2  ;;  %868 = vrsqrt.f32 %v116_v10 }
  0xbd   :  { %v87_v51 = vpop.xlane.xlu1 %86  ;;  %v857_v54 = vpop.eup %856  ;;  %v156_v55 = vmul.f32 14.285714, %v855_v47  ;;  %755 = vmatprep.subr.mxu0 %v173_v43  ;;  %811 = vmatprep.subr.mxu1 %v173_v43  ;;  %v115_v14 = vmax.f32 %v89_v50, 1e-24 }
  0xbe   :  { %756 = vmatpush3.xpose.msra.mxu0 %v173_v43  ;;  %827 = vmatpush3.xpose.msra.mxu1 %v173_v43  ;;  %v154_v62 = vmul.f32 14.285714, %v857_v54  ;;  %v114_v26 = vmax.f32 %v87_v51, 1e-24 }
  0xbf   :  { %v172_v58 = vmul.f32 %v156_v55, %v1018_v1  ;;  %870 = vrsqrt.f32 %v115_v14 }
  0xc0   :  { %v859_v3 = vpop.eup %858  ;;  %v85_v0 = vpop.xlane.xlu0 %84  ;;  %v170_v6 = vmul.f32 %v154_v62, %v1026_v5 }
  0xc1   :  { %v1147_v4 = vpop.xlane.xlu1 %82  ;;  %757 = vmatprep.subr.mxu0 %v172_v58  ;;  %812 = vmatprep.subr.mxu1 %v172_v58  ;;  %v153_v7 = vmul.f32 14.285714, %v859_v3  ;;  %v861_v1 = vpop.eup %860  ;;  %v113_v42 = vmax.f32 %v85_v0, 1e-24 }
  0xc2   :  { %758 = vmatpush3.xpose.msra.mxu0 %v172_v58  ;;  %828 = vmatpush3.xpose.msra.mxu1 %v172_v58  ;;  %v152_v18 = vmul.f32 14.285714, %v861_v1 }
  0xc3   :  { %759 = vmatprep.subr.mxu0 %v171_v59  ;;  %813 = vmatprep.subr.mxu1 %v171_v59  ;;  %v169_v15 = vmul.f32 %v153_v7, %v1032_v8 }
  0xc4   :  { %v1150_v11 = vpop.xlane.xlu0 %80  ;;  %v863_v5 = vpop.eup %862  ;;  %v168_v30 = vmul.f32 %v152_v18, %v1034_v9 }
  0xc5   :  { %v1152_v2 = vpop.xlane.xlu1 %78  ;;  %v865_v27 = vpop.eup %864  ;;  %v151_v31 = vmul.f32 14.285714, %v863_v5 }
  0xc6   :  { %760 = vmatpush3.xpose.msra.mxu0 %v171_v59  ;;  %829 = vmatpush3.xpose.msra.mxu1 %v171_v59  ;;  %v150_v39 = vmul.f32 14.285714, %v865_v27 }
  0xc7   :  { %761 = vmatprep.subr.mxu0 %v170_v6  ;;  %814 = vmatprep.subr.mxu1 %v170_v6  ;;  %v167_v38 = vmul.f32 %v151_v31, %v1040_v12  ;;  %v112_v12 = vmax.f32 %v1147_v4, 1e-24 }
  0xc8   :  { %v223_v19 = vpop.xlane.xlu0 %222  ;;  %v867_v43 = vpop.eup %866  ;;  %v166_v47 = vmul.f32 %v150_v39, %v1042_v13  ;;  %v111_v13 = vmax.f32 %v1150_v11, 1e-24 }
  0xc9   :  { %v1155_v22 = vpop.xlane.xlu1 %224  ;;  %v254_v23 = vmax.f32 %v223_v19, 1e-24  ;;  %v149_v50 = vmul.f32 14.285714, %v867_v43  ;;  %v869_v51 = vpop.eup %868 }
  0xca   :  { %762 = vmatpush3.xpose.msra.mxu0 %v170_v6  ;;  %830 = vmatpush3.xpose.msra.mxu1 %v170_v6  ;;  %v148_v62 = vmul.f32 14.285714, %v869_v51 }
  0xcb   :  { %763 = vmatprep.subr.mxu0 %v169_v15  ;;  %815 = vmatprep.subr.mxu1 %v169_v15  ;;  %872 = vrsqrt.f32 %v254_v23  ;;  %v165_v59 = vmul.f32 %v149_v50, %v1048_v16  ;;  %v110_v16 = vmax.f32 %v1152_v2, 1e-24 }
  0xcc   :  { %v239_v8 = vpop.xlane.xlu0 %238  ;;  %874 = vrsqrt.f32 %v114_v26  ;;  %v871_v58 = vpop.eup %870  ;;  %v164_v4 = vmul.f32 %v148_v62, %v1050_v17 }
  0xcd   :  { %v1158_v34 = vpop.xlane.xlu1 %240  ;;  %v262_v35 = vmax.f32 %v239_v8, 1e-24  ;;  %v147_v6 = vmul.f32 14.285714, %v871_v58 }
  0xce   :  { %764 = vmatpush3.xpose.msra.mxu0 %v169_v15  ;;  %831 = vmatpush3.xpose.msra.mxu1 %v169_v15 }
  0xcf   :  { %765 = vmatprep.subr.mxu0 %v168_v30  ;;  %816 = vmatprep.subr.mxu1 %v168_v30  ;;  %876 = vrsqrt.f32 %v262_v35 }
  0xd0   :  { %v1161_v9 = vpop.xlane.xlu0 %226  ;;  %878 = vrsqrt.f32 %v113_v42 }
  0xd1   :  { %v1163_v46 = vpop.xlane.xlu1 %242  ;;  %880 = vrsqrt.f32 %v112_v12  ;;  %v256_v23 = vmax.f32 %v1161_v9, 1e-24 }
  0xd2   :  { %766 = vmatpush3.xpose.msra.mxu0 %v168_v30  ;;  %832 = vmatpush3.xpose.msra.mxu1 %v168_v30  ;;  %882 = vrsqrt.f32 %v111_v13  ;;  %v264_v26 = vmax.f32 %v1163_v46, 1e-24 }
  0xd3   :  { %767 = vmatprep.subr.mxu0 %v167_v38  ;;  %817 = vmatprep.subr.mxu1 %v167_v38  ;;  %884 = vrsqrt.f32 %v110_v16 }
  0xd4   :  { %v1167_v54 = vpop.xlane.xlu0 %228 }
  0xd5   :  { %v1169_v55 = vpop.xlane.xlu1 %244 }
  0xd6   :  { %768 = vmatpush3.xpose.msra.mxu0 %v167_v38  ;;  %833 = vmatpush3.xpose.msra.mxu1 %v167_v38 }
  0xd7   :  { %769 = vmatprep.subr.mxu0 %v166_v47  ;;  %818 = vmatprep.subr.mxu1 %v166_v47 }
  0xd8   :  { %v873_v63 = vpop.eup %872  ;;  %v231_v7 = vpop.xlane.xlu0 %230 }
  0xd9   :  { %v286_v3 = vmul.f32 %v873_v63, %v1080_v32  ;;  %v875_v0 = vpop.eup %874  ;;  %v247_v1 = vpop.xlane.xlu1 %246  ;;  %v163_v32 = vmul.f32 %v147_v6, %v1056_v20  ;;  %v263_v20 = vmax.f32 %v1158_v34, 1e-24  ;;  %v258_v35 = vmax.f32 %v231_v7, 1e-24 }
  0xda   :  { %770 = vmatpush3.xpose.msra.mxu0 %v166_v47  ;;  %834 = vmatpush3.xpose.msra.mxu1 %v166_v47  ;;  %v146_v14 = vmul.f32 14.285714, %v875_v0  ;;  %v266_v38 = vmax.f32 %v247_v1, 1e-24 }
  0xdb   :  { %771 = vmatprep.subr.mxu0 %v165_v59  ;;  %819 = vmatprep.subr.mxu1 %v165_v59 }
  0xdc   :  { %v877_v10 = vpop.eup %876  ;;  %787 = vmatprep.mubr.f32.mxu0 %v286_v3  ;;  %v233_v15 = vpop.xlane.xlu0 %232  ;;  %v162_v18 = vmul.f32 %v146_v14, %v1058_v21  ;;  %v257_v21 = vmax.f32 %v1167_v54, 1e-24 }
  0xdd   :  { %v294_v11 = vmul.f32 %v877_v10, %v1088_v36  ;;  %v879_v17 = vpop.eup %878  ;;  %v249_v2 = vpop.xlane.xlu1 %248  ;;  %v255_v36 = vmax.f32 %v1155_v22, 1e-24  ;;  %v265_v22 = vmax.f32 %v1169_v55, 1e-24  ;;  %v259_v42 = vmax.f32 %v233_v15, 1e-24 }
  0xde   :  { %772 = vmatpush3.xpose.msra.mxu0 %v165_v59  ;;  %835 = vmatpush3.xpose.msra.mxu1 %v165_v59  ;;  %v145_v5 = vmul.f32 14.285714, %v879_v17  ;;  %v881_v19 = vpop.eup %880  ;;  %v267_v9 = vmax.f32 %v249_v2, 1e-24 }
  0xdf   :  { %773 = vmatprep.subr.mxu0 %v164_v4  ;;  %820 = vmatprep.subr.mxu1 %v164_v4  ;;  %v144_v30 = vmul.f32 14.285714, %v881_v19  ;;  %886 = vrsqrt.f32 %v255_v36  ;;  %v883_v8 = vpop.eup %882 }
  0xe0   :  { %799 = vmatprep.mubr.f32.mxu1 %v294_v11  ;;  %v161_v27 = vmul.f32 %v145_v5, %v1064_v24  ;;  %v235_v31 = vpop.xlane.xlu0 %234  ;;  %888 = vrsqrt.f32 %v263_v20  ;;  %v143_v39 = vmul.f32 14.285714, %v883_v8  ;;  %v885_v43 = vpop.eup %884 }
  0xe1   :  { %v251_v34 = vpop.xlane.xlu1 %250  ;;  %890 = vrsqrt.f32 %v256_v23  ;;  %v160_v24 = vmul.f32 %v144_v30, %v1066_v25  ;;  %v260_v46 = vmax.f32 %v235_v31, 1e-24  ;;  %v142_v54 = vmul.f32 14.285714, %v885_v43 }
  0xe2   :  { %774 = vmatpush3.xpose.msra.mxu0 %v164_v4  ;;  %836 = vmatpush3.xpose.msra.mxu1 %v164_v4  ;;  %892 = vrsqrt.f32 %v264_v26  ;;  %v268_v50 = vmax.f32 %v251_v34, 1e-24  ;;  %v159_v51 = vmul.f32 %v143_v39, %v1072_v28 }
  0xe3   :  { %775 = vmatprep.subr.mxu0 %v163_v32  ;;  %821 = vmatprep.subr.mxu1 %v163_v32  ;;  %894 = vrsqrt.f32 %v257_v21  ;;  %v158_v58 = vmul.f32 %v142_v54, %v1074_v29 }
  0xe4   :  { %896 = vrsqrt.f32 %v265_v22  ;;  %v237_v47 = vpop.xlane.xlu0 %236 }
  0xe5   :  { %898 = vrsqrt.f32 %v258_v35  ;;  %v253_v12 = vpop.xlane.xlu1 %252  ;;  %v261_v25 = vmax.f32 %v237_v47, 1e-24 }
  0xe6   :  { %776 = vmatpush3.xpose.msra.mxu0 %v163_v32  ;;  %837 = vmatpush3.xpose.msra.mxu1 %v163_v32  ;;  %900 = vrsqrt.f32 %v266_v38  ;;  %v269_v55 = vmax.f32 %v253_v12, 1e-24 }
  0xe7   :  { %777 = vmatprep.subr.mxu0 %v162_v18  ;;  %822 = vmatprep.subr.mxu1 %v162_v18  ;;  %902 = vrsqrt.f32 %v259_v42 }
  0xe8   :  { %904 = vrsqrt.f32 %v267_v9 }
  0xe9   :  { %906 = vrsqrt.f32 %v260_v46 }
  0xea   :  { %778 = vmatpush3.xpose.msra.mxu0 %v162_v18  ;;  %838 = vmatpush3.xpose.msra.mxu1 %v162_v18  ;;  %908 = vrsqrt.f32 %v268_v50  ;;  %v464_v18 = vlaneseq }
  0xeb   :  { %779 = vmatprep.subr.mxu0 %v161_v27  ;;  %823 = vmatprep.subr.mxu1 %v161_v27  ;;  %910 = vrsqrt.f32 %v261_v25 }
  0xec   :  { %v887_v59 = vpop.eup %886  ;;  %912 = vrsqrt.f32 %v269_v55  ;;  %v1204_v5 = vshrl.u32 %v464_v18, 7 }
  0xed   :  { %v889_v62 = vpop.eup %888  ;;  %v287_v0 = vmul.f32 %v887_v59, %v1082_v33 }
  0xee   :  { %780 = vmatpush3.xpose.msra.mxu0 %v161_v27  ;;  %839 = vmatpush3.xpose.msra.mxu1 %v161_v27  ;;  %v891_v28 = vpop.eup %890  ;;  %v295_v4 = vmul.f32 %v889_v62, %v1090_v37  ;;  %v469_v19 = vadd.s32 32, %v1204_v5  ;;  %v470_v27 = vadd.s32 40, %v1204_v5  ;;  %v471_v22 = vadd.s32 48, %v1204_v5 }
  0xef   :  { %781 = vmatprep.subr.mxu0 %v160_v24  ;;  %824 = vmatprep.subr.mxu1 %v160_v24  ;;  %v893_v13 = vpop.eup %892  ;;  %v288_v29 = vmul.f32 %v891_v28, %v1096_v40  ;;  %v472_v42 = vadd.s32 56, %v1204_v5  ;;  %v473_v12 = vadd.s32 64, %v1204_v5  ;;  %v474_v59 = vadd.s32 72, %v1204_v5 }
  0xf0   :  { %v895_v63 = vpop.eup %894  ;;  %v296_v16 = vmul.f32 %v893_v13, %v1098_v41 }
  0xf1   :  { %v897_v3 = vpop.eup %896  ;;  %v289_v11 = vmul.f32 %v895_v63, %v1104_v44 }
  0xf2   :  { %782 = vmatpush3.xpose.msra.mxu0 %v160_v24  ;;  %840 = vmatpush3.xpose.msra.mxu1 %v160_v24  ;;  %v899_v6 = vpop.eup %898  ;;  %v297_v32 = vmul.f32 %v897_v3, %v1106_v45 }
  0xf3   :  { %783 = vmatprep.subr.mxu0 %v159_v51  ;;  %825 = vmatprep.subr.mxu1 %v159_v51  ;;  %v901_v7 = vpop.eup %900  ;;  %v290_v33 = vmul.f32 %v899_v6, %v1112_v48 }
  0xf4   :  { %v903_v10 = vpop.eup %902  ;;  %v298_v37 = vmul.f32 %v901_v7, %v1114_v49 }
  0xf5   :  { %v905_v1 = vpop.eup %904  ;;  %v291_v41 = vmul.f32 %v903_v10, %v1120_v52  ;;  %v992_v52 = vmov -1e+30   ;;  %v476_v10 = vadd.s32 88, %v1204_v5 }
  0xf6   :  { %784 = vmatpush3.xpose.msra.mxu0 %v159_v51  ;;  %841 = vmatpush3.xpose.msra.mxu1 %v159_v51  ;;  %v907_v14 = vpop.eup %906  ;;  %v299_v15 = vmul.f32 %v905_v1, %v1122_v53  ;;  %44 = vst [vmem:[#allocation3] sm:$0x1] %v992_v52  ;;  %v993_v53 = vmov 0.0  }
  0xf7   :  { %785 = vmatprep.subr.mxu0 %v158_v58  ;;  %826 = vmatprep.subr.mxu1 %v158_v58  ;;  %v909_v17 = vpop.eup %908  ;;  %v292_v44 = vmul.f32 %v907_v14, %v1128_v56  ;;  %45 = vst [vmem:[#allocation4] sm:$0x1] %v993_v53  ;;  %v466_v56 = vadd.s32 8, %v1204_v5 }
  0xf8   :  { %v911_v40 = vpop.eup %910  ;;  %v300_v45 = vmul.f32 %v909_v17, %v1130_v57  ;;  %v1207_v57 = vand.u32 127, %v464_v18 }
  0xf9   :  { %v913_v2 = vpop.eup %912  ;;  %v293_v48 = vmul.f32 %v911_v40, %v1136_v60  ;;  %v467_v60 = vadd.s32 16, %v1204_v5 }
  0xfa   :  { %786 = vmatpush3.xpose.msra.mxu0 %v158_v58  ;;  %842 = vmatpush3.xpose.msra.mxu1 %v158_v58  ;;  %v301_v49 = vmul.f32 %v913_v2, %v1138_v61  ;;  %v468_v61 = vadd.s32 24, %v1204_v5  ;;  %vm537_vm0 = vcmp.eq.s32.totalorder %v466_v56, %v1207_v57  ;;  %vm536_vm1 = vcmp.eq.s32.totalorder %v1204_v5, %v1207_v57 }
  0xfb   :  { %vm538_vm2 = vcmp.eq.s32.totalorder %v467_v60, %v1207_v57  ;;  %v553_v23 = vsel %vm537_vm0, -1e+30, %v993_v53  ;;  %vm540_vm4 = vcmp.eq.s32.totalorder %v469_v19, %v1207_v57  ;;  %vm541_vm5 = vcmp.eq.s32.totalorder %v470_v27, %v1207_v57 }
  0xfc   :  { %vm539_vm3 = vcmp.eq.s32.totalorder %v468_v61, %v1207_v57  ;;  %v554_v31 = vsel %vm538_vm2, -1e+30, %v993_v53  ;;  %v556_v47 = vsel %vm540_vm4, -1e+30, %v993_v53  ;;  %vm542_vm6 = vcmp.eq.s32.totalorder %v471_v22, %v1207_v57 }
  0xfd   :  { %788 = vmatmul.mubr.f32.vlgmr.msra.gmra.mxu0 %v287_v0  ;;  %800 = vmatmul.mubr.f32.vlgmr.msra.gmra.mxu1 %v295_v4  ;;  %v555_v24 = vsel %vm539_vm3, -1e+30, %v993_v53  ;;  %v557_v55 = vsel %vm541_vm5, -1e+30, %v993_v53  ;;  %vm543_vm7 = vcmp.eq.s32.totalorder %v472_v42, %v1207_v57  ;;  %v558_v63 = vsel %vm542_vm6, -1e+30, %v993_v53 }
  0xfe   :  { %790 = vmatprep.mubr.f32.mxu0 %v288_v29  ;;  %802 = vmatprep.mubr.f32.mxu1 %v296_v16  ;;  %v475_v0 = vadd.s32 80, %v1204_v5  ;;  %vm544_vm8 = vcmp.eq.s32.totalorder %v473_v12, %v1207_v57  ;;  %v559_v16 = vsel %vm543_vm7, -1e+30, %v993_v53  ;;  %vm545_vm9 = vcmp.eq.s32.totalorder %v474_v59, %v1207_v57  ;;  %v590_v61 = vld [vmem:[#allocation3] sm:$0x1] }
  0xff   :  { %v560_v14 = vsel %vm544_vm8, -1e+30, %v993_v53  ;;  %v561_v40 = vsel %vm545_vm9, -1e+30, %v993_v53  ;;  %vm547_vm11 = vcmp.eq.s32.totalorder %v476_v10, %v1207_v57  ;;  %v480_v56 = vadd.s32 120, %v1204_v5 }
 0x100   :  { %vm546_vm10 = vcmp.eq.s32.totalorder %v475_v0, %v1207_v57  ;;  %v563_v52 = vsel %vm547_vm11, -1e+30, %v993_v53 }
 0x101   :  { %791 = vmatmul.mubr.f32.gmra.mxu0 %v289_v11  ;;  %803 = vmatmul.mubr.f32.gmra.mxu1 %v297_v32  ;;  %vm551_vm15 = vcmp.eq.s32.totalorder %v480_v56, %v1207_v57 }
 0x102   :  { %793 = vmatprep.mubr.f32.mxu0 %v290_v33  ;;  %805 = vmatprep.mubr.f32.mxu1 %v298_v37  ;;  %v477_v37 = vadd.s32 96, %v1204_v5 }
 0x104   :  { %vm548_vm12 = vcmp.eq.s32.totalorder %v477_v37, %v1207_v57 }
 0x105   :  { %794 = vmatmul.mubr.f32.gmra.mxu0 %v291_v41  ;;  %806 = vmatmul.mubr.f32.gmra.mxu1 %v299_v15  ;;  %v478_v15 = vadd.s32 104, %v1204_v5 }
 0x106   :  { %796 = vmatprep.mubr.f32.mxu0 %v292_v44  ;;  %808 = vmatprep.mubr.f32.mxu1 %v300_v45  ;;  %v562_v44 = vsel %vm546_vm10, -1e+30, %v993_v53 }
 0x107   :  { %vm549_vm13 = vcmp.eq.s32.totalorder %v478_v15, %v1207_v57 }
 0x108   :  { %v565_v27 = vsel %vm549_vm13, -1e+30, %v993_v53 }
 0x109   :  { %797 = vmatmul.mubr.f32.gmra.mxu0 %v293_v48  ;;  %809 = vmatmul.mubr.f32.gmra.mxu1 %v301_v49  ;;  %v479_v48 = vadd.s32 112, %v1204_v5 }
 0x10b   :  { %vm550_vm14 = vcmp.eq.s32.totalorder %v479_v48, %v1207_v57 }
 0x1bd   :  { %v789_v36 = vpop.f32.mrf.mxu0  ;;  %v801_v20 = vpop.f32.mrf.mxu1 }
 0x1be   :  { %v564_v36 = vsel %vm548_vm12, -1e+30, %v993_v53  ;;  %v621_v20 = vsub.s32 0, %v1204_v5 }
 0x1bf   :  { %v1217_v26 = vpop.f32.mrf.mxu0  ;;  %v424_v30 = vpop.f32.mrf.mxu1 }
 0x1c0   :  { %v552_v21 = vsel %vm536_vm1, %v1217_v26, 0.0  ;;  %v591_v8 = vmax.f32 %v1217_v26, -1e+30 }
 0x1c1   :  { %v568_v34 = vadd.f32 %v553_v23, %v552_v21  ;;  %v792_v35 = vpop.f32.mrf.mxu0  ;;  %v804_v38 = vpop.f32.mrf.mxu1 }
 0x1c2   :  { %v595_v39 = vmax.f32 %v591_v8, -1e+30 }
 0x1c3   :  { %v569_v43 = vadd.f32 %v568_v34, %v554_v31  ;;  %v394_v9 = vpop.f32.mrf.mxu0  ;;  %v434_v46 = vpop.f32.mrf.mxu1  ;;  %v566_v31 = vsel %vm550_vm14, -1e+30, %v993_v53  ;;  %v567_v34 = vsel %vm551_vm15, -1e+30, %v993_v53 }
 0x1c4   :  { %v599_v50 = vmax.f32 %v595_v39, -1e+30 }
 0x1c5   :  { %v570_v51 = vadd.f32 %v569_v43, %v555_v24  ;;  %v795_v54 = vpop.f32.mrf.mxu0  ;;  %v807_v25 = vpop.f32.mrf.mxu1 }
 0x1c6   :  { %v603_v58 = vmax.f32 %v599_v50, -1e+30 }
 0x1c7   :  { %v571_v62 = vadd.f32 %v570_v51, %v556_v47  ;;  %v404_v28 = vpop.f32.mrf.mxu0  ;;  %v444_v13 = vpop.f32.mrf.mxu1 }
 0x1c8   :  { %v605_v3 = vmax.f32 %v603_v58, -1e+30 }
 0x1c9   :  { %v572_v4 = vadd.f32 %v571_v62, %v557_v55  ;;  %v798_v6 = vpop.f32.mrf.mxu0  ;;  %v810_v29 = vpop.f32.mrf.mxu1 }
 0x1ca   :  { %v606_v7 = vrot.slane %v605_v3, 4 }
 0x1cb   :  { %v573_v1 = vadd.f32 %v572_v4, %v558_v63  ;;  %v414_v11 = vpop.f32.mrf.mxu0  ;;  %v454_v32 = vpop.f32.mrf.mxu1 }
 0x1cc   :  { %v607_v33 = vmax.f32 %v605_v3, %v606_v7 }
 0x1cd   :  { %v574_v17 = vadd.f32 %v573_v1, %v559_v16 }
 0x1ce   :  { %v608_v41 = vrot.slane %v607_v33, 2 }
 0x1cf   :  { %v575_v2 = vadd.f32 %v574_v17, %v560_v14  ;;  %v616_v14 = vld [vmem:[#allocation4] sm:$0x1] }
 0x1d0   :  { %v609_v45 = vmax.f32 %v607_v33, %v608_v41 }
 0x1d1   :  { %v576_v49 = vadd.f32 %v575_v2, %v561_v40 }
 0x1d2   :  { %v610_v18 = vrot.slane %v609_v45, 1 }
 0x1d3   :  { %v577_v60 = vadd.f32 %v576_v49, %v562_v44 }
 0x1d4   :  { %v611_v19 = vmax.f32 %v609_v45, %v610_v18 }
 0x1d5   :  { %v578_v23 = vadd.f32 %v577_v60, %v563_v52 }
 0x1d6   :  { %v612_v30 = vmax.f32 %v590_v61, %v611_v19 }
 0x1d7   :  { %v579_v21 = vadd.f32 %v578_v23, %v564_v36 }
 0x1d8   :  { %v622_v8 = vrot.slane %v612_v30, %v621_v20  ;;  %695 = vst [vmem:[#allocation3] sm:$0x1] %v612_v30  ;;  %v613_v28 = vsub.f32 %v590_v61, %v612_v30 }
 0x1d9   :  { %v580_v22 = vadd.f32 %v579_v21, %v565_v27 }
 0x1da   :  { %v624_v35 = vsub.f32 %v1217_v26, %v622_v8  ;;  %v625_v38 = vsub.f32 -1e+30, %v622_v8  ;;  %v614_v3 = vmul.f32 1.442695, %v613_v28 }
 0x1db   :  { %v581_v5 = vadd.f32 %v580_v22, %v566_v31 }
 0x1dc   :  { %v640_v24 = vmul.f32 1.442695, %v624_v35  ;;  %v642_v39 = vmul.f32 1.442695, %v625_v38 }
 0x1dd   :  { %v582_v42 = vadd.f32 %v581_v5, %v567_v34 }
 0x1de   :  { %914 = vpow2.f32 %v640_v24 }
 0x1df   :  { %v583_v43 = vrot.slane %v582_v42, 4  ;;  %916 = vpow2.f32 %v642_v39  ;;  %v699_v44 = vld [vmem:[#allocation3] sm:$0x1] }
 0x1e0   :  { %918 = vpow2.f32 %v614_v3 }
 0x1e1   :  { %v584_v9 = vadd.f32 %v583_v43, %v582_v42 }
 0x1e3   :  { %v585_v57 = vrot.slane %v584_v9, 2 }
 0x1e5   :  { %v586_v46 = vadd.f32 %v585_v57, %v584_v9 }
 0x1e7   :  { %v587_v47 = vrot.slane %v586_v46, 1 }
 0x1e9   :  { %v588_v50 = vadd.f32 %v587_v47, %v586_v46 }
 0x1eb   :  { %v915_v12 = vpop.eup %914  ;;  %589 = vst [vmem:[#allocation5] sm:$0x1] %v588_v50 }
 0x1ec   :  { %v917_v51 = vpop.eup %916 }
 0x1ed   :  { %v672_v54 = vadd.f32 %v917_v51, %v915_v12  ;;  %v919_v32 = vpop.eup %918 }
 0x1ee   :  { %v617_v37 = vmul.f32 %v919_v32, %v616_v14 }
 0x1ef   :  { %v673_v53 = vadd.f32 %v917_v51, %v672_v54 }
 0x1f1   :  { %v674_v25 = vadd.f32 %v917_v51, %v673_v53 }
 0x1f2   :  { %v704_v48 = vld [vmem:[#allocation5] sm:$0x1] }
 0x1f3   :  { %v675_v26 = vadd.f32 %v917_v51, %v674_v25 }
 0x1f5   :  { %v676_v55 = vadd.f32 %v917_v51, %v675_v26 }
 0x1f7   :  { %v677_v58 = vadd.f32 %v917_v51, %v676_v55 }
 0x1f9   :  { %v678_v59 = vadd.f32 %v917_v51, %v677_v58 }
 0x1fb   :  { %v679_v62 = vadd.f32 %v917_v51, %v678_v59 }
 0x1fd   :  { %v680_v13 = vadd.f32 %v917_v51, %v679_v62 }
 0x1ff   :  { %v681_v63 = vadd.f32 %v917_v51, %v680_v13 }
 0x201   :  { %v682_v0 = vadd.f32 %v917_v51, %v681_v63 }
 0x203   :  { %v683_v4 = vadd.f32 %v917_v51, %v682_v0 }
 0x205   :  { %v684_v6 = vadd.f32 %v917_v51, %v683_v4 }
 0x207   :  { %v685_v29 = vadd.f32 %v917_v51, %v684_v6 }
 0x209   :  { %v686_v16 = vadd.f32 %v917_v51, %v685_v29 }
 0x20b   :  { %v687_v7 = vrot.slane %v686_v16, 4 }
 0x20d   :  { %v688_v10 = vadd.f32 %v687_v7, %v686_v16 }
 0x20f   :  { %v689_v1 = vrot.slane %v688_v10, 2 }
 0x211   :  { %v690_v11 = vadd.f32 %v689_v1, %v688_v10 }
 0x213   :  { %v691_v33 = vrot.slane %v690_v11, 1 }
 0x215   :  { %v692_v17 = vadd.f32 %v691_v33, %v690_v11 }
 0x217   :  { %v693_v40 = vadd.f32 %v692_v17, %v617_v37 }
 0x219   :  { %694 = vst [vmem:[#allocation4] sm:$0x1] %v693_v40 }
 0x220   :  { %v700_v41 = vld [vmem:[#allocation4] sm:$0x1] }
 0x221   :  { %920 = vlog2.f32 %v700_v41 }
 0x22e   :  { %v921_v15 = vpop.eup %920 }
 0x22f   :  { %v702_v2 = vmul.f32 0.6931472, %v921_v15 }
 0x231   :  { %v703_v45 = vadd.f32 %v702_v2, %v699_v44 }
 0x233   :  { %v705_v49 = vsub.f32 %v703_v45, %v704_v48 }
 0x235   :  { %706 = vst [vmem:[#allocation11] sm:$0x1] %v705_v49 }
 0x236   :  { %973 = shalt.err (!%p970_p0)
}
 0x237   :  { %716 = dma.vmem_to_hbm [thread:$0]  %s714_s1, 16, %s1266_s2, [#allocation8]  }
 0x238   :  { %986 = dma.done.wait [#allocation8], 16  }
 0x239   :  { %987 = vsyncadd [#allocation8], 4294967280 }
 0x23a   :  { %720 = vsyncpa [#allocation7], 1 }
 0x23b   :  { %721 = vsyncpa [#allocation10], 1 }
 0x23c   :  { %722 = vsyncpa [#allocation8], 1 }

</bundles_post_ra>
